<compile_context>
chip_gen: v6e
topology: v6e:2x2x1
jax: 0.10.0
libtpu: 0.0.40
codegen_flags: <defaults>
</compile_context>

<pallas_src>
import functools
import math

import numpy as np
import jax
import jax.numpy as jnp
from jax.experimental import pallas as pl
from jax.experimental.pallas import tpu as pltpu


def _lcm(a, b):
    return a * b // math.gcd(a, b)


def _softplus_mask_kernel(x_ref, o_ref, *, beta, threshold, epsilon, dim, last):
    """Softplus over a lane-dense flattened view; optional column mask."""
    x = x_ref[...]
    xf = x.astype(jnp.float32)
    z = beta * xf
    # nn.Softplus: (1/beta)*log(1+exp(beta*x)); passthrough when beta*x > threshold.
    sp = jnp.where(z > threshold, xf, jnp.log1p(jnp.exp(z)) / beta) + epsilon
    if dim is None:
        out = sp
    else:
        # Original column index of each element in the flattened view.
        col = jax.lax.broadcasted_iota(jnp.int32, xf.shape, xf.ndim - 1) % last
        out = jnp.where(col < dim, sp, xf)
    o_ref[...] = out.astype(o_ref.dtype)


def _softplus_split_kernel(x_ref, o_ref, *, beta, threshold, epsilon, split):
    """Static 128-aligned split: softplus on [:, :split], copy for [:, split:]."""
    x_sp = x_ref[:, :split].astype(jnp.float32)
    z = beta * x_sp
    sp = jnp.where(z > threshold, x_sp, jnp.log1p(jnp.exp(z)) / beta) + epsilon
    o_ref[:, :split] = sp.astype(o_ref.dtype)
    o_ref[:, split:] = x_ref[:, split:]


def _pick_lane_dim(total, unit, lane_cap):
    """Largest L (multiple of `unit`, dividing total, <= lane_cap) keeping R >= 8
    rows when possible."""
    kmax = min(lane_cap // unit, total // unit)
    best = 0
    for k in range(kmax, 0, -1):
        cand = k * unit
        if total % cand != 0:
            continue
        if best == 0:
            best = cand
        if total // cand >= 8:
            return cand
    return best


def softplus_pallas(x, beta=1.0, threshold=20.0, epsilon=1e-15, dim=None):
    orig_shape = x.shape
    last = int(orig_shape[-1])
    total = int(np.prod(orig_shape))
    itemsize = np.dtype(x.dtype).itemsize

    # Normalize dim using PyTorch x[..., :dim] slicing semantics (incl. negatives).
    if dim is None:
        dim_eff = None
    else:
        d = int(dim)
        if d < 0:
            d += last
        d = max(0, min(d, last))
        dim_eff = None if d >= last else d

    if dim_eff == 0:
        # softplus applied to zero columns -> pure passthrough.
        return x

    LANE_CAP = 4096               # max elements along the lane axis of the view
    TILE_BYTES = 2 * 1024 * 1024  # ~2 MiB/tile -> ~8 MiB double-buffered in+out

    aligned_split = (
        dim_eff is not None and last % 128 == 0 and dim_eff % 128 == 0
    )

    if aligned_split:
        # Keep the original trailing axis as the lane axis; static column split
        # skips transcendental work on the passthrough columns.
        L = last
    else:
        unit = 128 if dim_eff is None else _lcm(last, 128)
        L = 0
        if unit <= LANE_CAP and total % unit == 0:
            L = _pick_lane_dim(total, unit, LANE_CAP)
        if L == 0:
            # Fallback: original (rows, last) layout (full trailing dim per block).
            L = last
    R = total // L

    # Row tile sized by VMEM budget; divisible by 8 unless it spans the full R.
    row_bytes = L * itemsize
    budget_rows = max(8, (TILE_BYTES // max(row_bytes, 1)) // 8 * 8)
    tile_r = R if R <= budget_rows else budget_rows
    grid = (pl.cdiv(R, tile_r),)

    if aligned_split:
        kernel = functools.partial(
            _softplus_split_kernel,
            beta=float(beta), threshold=float(threshold),
            epsilon=float(epsilon), split=dim_eff)
    else:
        kernel = functools.partial(
            _softplus_mask_kernel,
            beta=float(beta), threshold=float(threshold),
            epsilon=float(epsilon), dim=dim_eff, last=last)

    x2 = x.reshape(R, L)
    out2 = pl.pallas_call(
        kernel,
        out_shape=jax.ShapeDtypeStruct((R, L), x.dtype),
        grid_spec=pltpu.PrefetchScalarGridSpec(
            num_scalar_prefetch=0,
            grid=grid,
            in_specs=[pl.BlockSpec((tile_r, L), lambda i: (i, 0))],
            out_specs=pl.BlockSpec((tile_r, L), lambda i: (i, 0)),
        ),
        compiler_params=pltpu.CompilerParams(
            dimension_semantics=("parallel",),
            vmem_limit_bytes=32 * 1024 * 1024,
        ),
    )(x2)
    return out2.reshape(orig_shape)


def _reference(x, beta=1.0, threshold=20.0, epsilon=1e-15, dim=None):
    z = beta * x
    sp = jnp.where(z > threshold, x, jnp.log1p(jnp.exp(z)) / beta) + epsilon
    if dim is None:
        return sp
    return jnp.concatenate([sp[..., :dim], x[..., dim:]], axis=-1)


if __name__ == "__main__":
    key = jax.random.PRNGKey(0)
    # NCHW, small shapes (matches the PyTorch module's typical use).
    x = jax.random.normal(key, (2, 4, 16, 16), dtype=jnp.float32) * 5.0

    # Case 1: dim=None (softplus + epsilon over the whole tensor)
    y1 = softplus_pallas(x, beta=1.0, threshold=20.0, epsilon=1e-15, dim=None)
    jax.block_until_ready(y1)
    ref1 = _reference(x, dim=None)
    np.testing.assert_allclose(np.asarray(y1), np.asarray(ref1), rtol=1e-6, atol=1e-6)

    # Case 2: dim=8 (softplus on first 8 of last axis, passthrough for the rest)
    y2 = softplus_pallas(x, beta=1.0, threshold=20.0, epsilon=1e-15, dim=8)
    jax.block_until_ready(y2)
    ref2 = _reference(x, dim=8)
    np.testing.assert_allclose(np.asarray(y2), np.asarray(ref2), rtol=1e-6, atol=1e-6)

    print("KERNEL_OK")
</pallas_src>

<mosaic_0001>
module attributes {stable_mosaic.version = 11 : i64} {
  func.func @_softplus_mask_kernel(%arg0: i32, %arg1: memref<8x256xf32, #tpu.memory_space<vmem>>, %arg2: memref<8x256xf32, #tpu.memory_space<vmem>>) attributes {dimension_semantics = [#tpu.dimension_semantics<parallel>], iteration_bounds = array<i64: 1>, scalar_prefetch = 0 : i64, scratch_operands = 0 : i64, tpu.core_type = #tpu.core_type<tc>, window_params = [{transform_indices = @transform_0, window_bounds = array<i64: 8, 256>}, {transform_indices = @transform_1, window_bounds = array<i64: 8, 256>}]} {
    %c0 = arith.constant 0 : index
    %c0_0 = arith.constant 0 : index
    %0 = vector.load %arg1[%c0, %c0_0] : memref<8x256xf32, #tpu.memory_space<vmem>>, vector<8x256xf32>
    %cst = arith.constant 1.000000e+00 : f32
    %1 = vector.broadcast %cst : f32 to vector<8x256xf32>
    %2 = arith.mulf %1, %0 : vector<8x256xf32>
    %cst_1 = arith.constant 2.000000e+01 : f32
    %3 = vector.broadcast %cst_1 : f32 to vector<8x256xf32>
    %4 = arith.cmpf ogt, %2, %3 : vector<8x256xf32>
    %5 = math.exp %2 : vector<8x256xf32>
    %6 = math.log1p %5 : vector<8x256xf32>
    %cst_2 = arith.constant 1.000000e+00 : f32
    %7 = vector.broadcast %cst_2 : f32 to vector<8x256xf32>
    %8 = arith.divf %6, %7 : vector<8x256xf32>
    %9 = arith.select %4, %0, %8 : vector<8x256xi1>, vector<8x256xf32>
    %cst_3 = arith.constant 1.000000e-15 : f32
    %10 = vector.broadcast %cst_3 : f32 to vector<8x256xf32>
    %11 = arith.addf %9, %10 : vector<8x256xf32>
    %c0_4 = arith.constant 0 : index
    %c0_5 = arith.constant 0 : index
    %12 = vector.load %arg2[%c0_4, %c0_5] : memref<8x256xf32, #tpu.memory_space<vmem>>, vector<8x256xf32>
    tpu.vector_store %arg2[%c0_4, %c0_5], %11 {strides = array<i32>} : memref<8x256xf32, #tpu.memory_space<vmem>>, vector<8x256xf32>,
    return
  }
  func.func @transform_0(%arg0: i32) -> (i32, i32) {
    %c0_i32 = arith.constant 0 : i32
    %c0_i32_0 = arith.constant 0 : i32
    return %arg0, %c0_i32 : i32, i32
  }
  func.func @transform_1(%arg0: i32) -> (i32, i32) {
    %c0_i32 = arith.constant 0 : i32
    %c0_i32_0 = arith.constant 0 : i32
    return %arg0, %c0_i32 : i32, i32
  }
}

</mosaic_0001>

<bundles_post_ra>
// kernel: tpu_custom_call.1
= control target key start
LH: loop header
LB: loop body
LE: loop exit
PB: predicated region body
PF: predicated region fallthrough
CT: control target
= control target key end

     0   :  { %6 = vsyncpa [#allocation3], 0  ;;  %s140_s0 = inlined_call_operand.hbm [shape: f32[8,256], index: 0, kind: input, shape index: {}]   ;;  %s141_s1 = inlined_call_operand.hbm [shape: f32[8,256], index: 1, kind: output, shape index: {}]  }
   0x1   :  { %7 = vsyncpa [#allocation4], 0  ;;  %s122_s6 = smov [#allocation2]  }
   0x2   :  { %s14_s7 = sshll.u32 %s122_s6, 4  ;;  %s15_s7 = int_to_ptr.vmem [resolvable:$true] %s14_s7 }
   0x3   :  { %s86_s8 = scalar_lea.vmem %s15_s7, 256  ;;  %p91_p1 = scmp.lt.s32.totalorder %s15_s7, %s15_s7 }
   0x4   :  { %p87_p0 = scmp.ne.s32.totalorder %s15_s7, %s86_s8  ;;  %p92_p2 = scmp.lt.s32.totalorder %s86_s8, %s86_s8 }
   0x6   :  { %p93_p3 = por %p92_p2, %p91_p1 }
   0x8   :  { %p94_p4 = pnand %p93_p3, %p87_p0 }
   0xa   :  { %97 = shalt.err (!%p94_p4)
}
   0xb   :  { %17 = dma.hbm_to_vmem [thread:$0]  %s140_s0, 256, %s15_s7, [#allocation3]  }
   0xc   :  { %118 = dma.done.wait [#allocation3], 256  }
   0xd   :  { %119 = vsyncadd [#allocation3], 4294967040  ;;  %v21_v0 = vld [vmem:[#allocation2] sm:$0xff]  ;;  %v22_v1 = vld [vmem:[#allocation2 + $0x8] sm:$0xff]  ;;  %s123_s0 = smov [#allocation5]  }
   0xe   :  { %v25_v2 = vmul.f32 1.442695, %v21_v0  ;;  %v27_v3 = vmul.f32 1.442695, %v22_v1  ;;  %vm23_vm1 = vcmp.gt.f32.partialorder %v21_v0, 20.0  ;;  %vm24_vm3 = vcmp.gt.f32.partialorder %v22_v1, 20.0 }
   0xf   :  { %s59_s11 = sshll.u32 %s123_s0, 4  ;;  %s60_s11 = int_to_ptr.vmem [resolvable:$true] %s59_s11 }
  0x10   :  { %70 = vpow2.f32 %v25_v2  ;;  %s98_s12 = scalar_lea.vmem %s60_s11, 256  ;;  %p103_p6 = scmp.lt.s32.totalorder %s60_s11, %s60_s11 }
  0x11   :  { %72 = vpow2.f32 %v27_v3  ;;  %p99_p5 = scmp.ne.s32.totalorder %s60_s11, %s98_s12  ;;  %p104_p7 = scmp.lt.s32.totalorder %s98_s12, %s98_s12 }
  0x13   :  { %p105_p8 = por %p104_p7, %p103_p6 }
  0x15   :  { %p106_p9 = pnand %p105_p8, %p99_p5 }
  0x1d   :  { %v71_v4 = vpop.eup %70 }
  0x1e   :  { %v73_v5 = vpop.eup %72  ;;  %v29_v6 = vadd.f32 1.0, %v71_v4  ;;  %v32_v8 = vmul.f32 -0.5, %v71_v4  ;;  %v35_v11 = vand.u32 2147483647, %v71_v4 }
  0x1f   :  { %v38_v7 = vadd.f32 1.0, %v73_v5  ;;  %v41_v9 = vmul.f32 -0.5, %v73_v5  ;;  %v44_v13 = vand.u32 2147483647, %v73_v5 }
  0x20   :  { %74 = vlog2.f32 %v29_v6  ;;  %v33_v10 = vadd.f32 1.0, %v32_v8  ;;  %vm36_vm0 = vcmp.lt.f32.partialorder %v35_v11, 0.0004427343 }
  0x21   :  { %76 = vlog2.f32 %v38_v7  ;;  %v42_v12 = vadd.f32 1.0, %v41_v9  ;;  %vm45_vm2 = vcmp.lt.f32.partialorder %v44_v13, 0.0004427343 }
  0x22   :  { %v34_v14 = vmul.f32 %v71_v4, %v33_v10 }
  0x23   :  { %v43_v16 = vmul.f32 %v73_v5, %v42_v12 }
  0x2d   :  { %v75_v15 = vpop.eup %74 }
  0x2e   :  { %v77_v17 = vpop.eup %76  ;;  %v31_v18 = vmul.f32 0.6931472, %v75_v15 }
  0x2f   :  { %v40_v19 = vmul.f32 0.6931472, %v77_v17 }
  0x30   :  { %v37_v20 = vsel %vm36_vm0, %v34_v14, %v31_v18 }
  0x31   :  { %v47_v21 = vsel %vm23_vm1, %v21_v0, %v37_v20  ;;  %v46_v22 = vsel %vm45_vm2, %v43_v16, %v40_v19 }
  0x32   :  { %v49_v23 = vadd.f32 1e-15, %v47_v21  ;;  %v48_v24 = vsel %vm24_vm3, %v22_v1, %v46_v22 }
  0x33   :  { %v50_v25 = vadd.f32 1e-15, %v48_v24 }
  0x34   :  { %51 = vst [vmem:[#allocation5] sm:$0xff] %v49_v23 }
  0x35   :  { %52 = vst [vmem:[#allocation5 + $0x8] sm:$0xff] %v50_v25 }
  0x36   :  { %109 = shalt.err (!%p106_p9)
}
  0x37   :  { %62 = dma.vmem_to_hbm [thread:$0]  %s60_s11, 256, %s141_s1, [#allocation4]  }
  0x38   :  { %120 = dma.done.wait [#allocation4], 256  }
  0x39   :  { %121 = vsyncadd [#allocation4], 4294967040 }
  0x3a   :  { %66 = vsyncpa [#allocation3], 1 }
  0x3b   :  { %67 = vsyncpa [#allocation4], 1 }

</bundles_post_ra>
